<compile_context>
chip_gen: v7x
topology: tpu7x:2x2x1
jax: 0.10.0
libtpu: 0.0.40
codegen_flags: <defaults>
</compile_context>

<pallas_src>
import jax
import jax.numpy as jnp
from jax import lax
from jax.experimental import pallas as pl
from jax.experimental.pallas import tpu as pltpu

_SUBLANE = 8  # f32 sublane tile


def _make_lstm_kernel(T, B, Bp, D, H):
    H4 = 4 * H

    def kernel(x_ref, wih_ref, whh_ref, bih_ref, bhh_ref, h_out_ref, c_out_ref):
        # ---- Loop-invariant prep (all hoisted out of the recurrence) --------
        # The "g" gate occupies rows/columns [2H, 3H); i, f, o use
        # sigmoid(x) = 0.5*tanh(0.5*x) + 0.5, whose 0.5 pre-scale is folded
        # into the weights / bias here (f32, before the bf16 narrowing).
        def is_g(idx):
            return (idx >= 2 * H) & (idx < 3 * H)

        row_ih = lax.broadcasted_iota(jnp.int32, (H4, D), 0)
        row_hh = lax.broadcasted_iota(jnp.int32, (H4, H), 0)
        col = lax.broadcasted_iota(jnp.int32, (Bp, H4), 1)

        wih = wih_ref[...]                                       # (4H, D) f32
        whh = whh_ref[...]                                       # (4H, H) f32
        wih_s = jnp.where(is_g(row_ih), wih, 0.5 * wih).astype(jnp.bfloat16)
        whh_s = jnp.where(is_g(row_hh), whh, 0.5 * whh).astype(jnp.bfloat16)

        bias = bih_ref[...] + bhh_ref[...]                       # (1, 4H) f32
        bias_s = jnp.where(is_g(col[:1, :]), bias, 0.5 * bias)   # folded pre-scale

        # Full-shape constants so nothing re-broadcasts inside the loop.
        post_scale = jnp.where(is_g(col), 1.0, 0.5)              # (Bp, 4H) f32
        post_bias = jnp.where(is_g(col), 0.0, 0.5)               # (Bp, 4H) f32

        # ---- One-shot input projection for ALL timesteps: (T*Bp, 4H) --------
        # bf16 MXU operands, f32 accumulation; contraction on the weights'
        # last axis == trans_b, so no transposed weight copy is materialised.
        xg = lax.dot_general(
            x_ref[...].astype(jnp.bfloat16), wih_s,
            dimension_numbers=(((1,), (1,)), ((), ())),
            preferred_element_type=jnp.float32) + bias_s

        h = jnp.zeros((Bp, H), jnp.float32)
        c = jnp.zeros((Bp, H), jnp.float32)

        # ---- Recurrence: T is small & static -> fully unrolled.  Bp == 8
        # keeps every xg slice a tile-aligned (8, 128) view (free extraction).
        for t in range(T):
            hg = lax.dot_general(
                h.astype(jnp.bfloat16), whh_s,
                dimension_numbers=(((1,), (1,)), ((), ())),
                preferred_element_type=jnp.float32)              # (Bp, 4H)
            gates = xg[t * Bp:(t + 1) * Bp, :] + hg
            # One EUP tanh over the whole (Bp, 4H) slab does all four gates.
            act = jnp.tanh(gates) * post_scale + post_bias
            i_g = act[:, 0 * H:1 * H]
            f_g = act[:, 1 * H:2 * H]
            g_g = act[:, 2 * H:3 * H]
            o_g = act[:, 3 * H:4 * H]
            c = f_g * c + i_g * g_g
            h = o_g * jnp.tanh(c)

        h_out_ref[...] = h[:B, :].astype(h_out_ref.dtype)
        c_out_ref[...] = c[:B, :].astype(c_out_ref.dtype)

    return kernel


def _round_up(n, m):
    return ((n + m - 1) // m) * m


@jax.jit
def encoder_lstm_forward(src, w_ih, w_hh, b_ih, b_hh):
    """src: (T, B, D); w_ih: (4H, D); w_hh: (4H, H); biases: (4H,).
    Returns (hidden, cell), each (1, B, H), matching nn.LSTM (zero init state)."""
    T, B, D = src.shape
    H = w_hh.shape[1]
    H4 = 4 * H
    Bp = _round_up(B, _SUBLANE)

    # Compile-time guard: this grid-less design keeps everything VMEM-resident.
    # Refuse shapes that cannot fit rather than failing deep inside Mosaic.
    resident = (T * Bp * (D + H4) * 4          # x (f32) + xg slab (f32)
                + T * Bp * D * 2               # bf16 copy of x
                + H4 * (D + H) * 6             # weights f32 + scaled bf16 copies
                + 8 * Bp * H4 * 4)             # per-step temporaries (slack)
    if resident > 48 * 1024 * 1024:
        raise ValueError(
            f"EncoderLSTM pallas kernel needs ~{resident / 2**20:.1f} MiB of "
            "VMEM; chunk T with a grid axis for shapes this large "
            "(see TODO in kernel).")

    # Pad batch to a sublane multiple so the per-timestep gate slices are
    # tile-aligned, then flatten (T, Bp, D) -> (T*Bp, D).
    if Bp != B:
        src = jnp.pad(src, ((0, 0), (0, Bp - B), (0, 0)))
    x2d = src.reshape(T * Bp, D)

    vmem = pl.BlockSpec(memory_space=pltpu.MemorySpace.VMEM)
    hidden, cell = pl.pallas_call(
        _make_lstm_kernel(T, B, Bp, D, H),
        out_shape=(jax.ShapeDtypeStruct((B, H), src.dtype),
                   jax.ShapeDtypeStruct((B, H), src.dtype)),
        in_specs=[vmem] * 5,                    # x2d, W_ih, W_hh, b_ih, b_hh
        out_specs=(vmem, vmem),                 # hidden, cell
    )(x2d, w_ih, w_hh, b_ih.reshape(1, H4), b_hh.reshape(1, H4))

    # nn.LSTM returns (num_layers, B, H).
    return hidden[None, :, :], cell[None, :, :]


def _reference_lstm(src, w_ih, w_hh, b_ih, b_hh):
    """Pure-JAX f32 reference mirroring torch.nn.LSTM (1 layer, zero init)."""
    T, B, D = src.shape
    H = w_hh.shape[1]
    bias = b_ih + b_hh

    def step(carry, x_t):
        h, c = carry
        gates = x_t @ w_ih.T + h @ w_hh.T + bias
        i = jax.nn.sigmoid(gates[:, 0 * H:1 * H])
        f = jax.nn.sigmoid(gates[:, 1 * H:2 * H])
        g = jnp.tanh(gates[:, 2 * H:3 * H])
        o = jax.nn.sigmoid(gates[:, 3 * H:4 * H])
        c_new = f * c + i * g
        h_new = o * jnp.tanh(c_new)
        return (h_new, c_new), None

    h0 = jnp.zeros((B, H), jnp.float32)
    c0 = jnp.zeros((B, H), jnp.float32)
    (hT, cT), _ = jax.lax.scan(step, (h0, c0), src)
    return hT[None], cT[None]


if __name__ == "__main__":
    # Small shapes implied by the module: seq=8, batch=4, input_dim=16, hidden=32
    T, B, D, H = 8, 4, 16, 32

    key = jax.random.PRNGKey(0)
    k1, k2, k3, k4, k5 = jax.random.split(key, 5)

    scale = 1.0 / jnp.sqrt(H)
    src = jax.random.normal(k1, (T, B, D), dtype=jnp.float32)
    w_ih = jax.random.uniform(k2, (4 * H, D), jnp.float32, -scale, scale)
    w_hh = jax.random.uniform(k3, (4 * H, H), jnp.float32, -scale, scale)
    b_ih = jax.random.uniform(k4, (4 * H,), jnp.float32, -scale, scale)
    b_hh = jax.random.uniform(k5, (4 * H,), jnp.float32, -scale, scale)

    hidden, cell = encoder_lstm_forward(src, w_ih, w_hh, b_ih, b_hh)
    hidden = jax.block_until_ready(hidden)
    cell = jax.block_until_ready(cell)

    ref_h, ref_c = _reference_lstm(src, w_ih, w_hh, b_ih, b_hh)
    assert hidden.shape == (1, B, H) and cell.shape == (1, B, H)
    # bf16 MXU operands (f32 accumulation / f32 state math) vs a pure-f32
    # reference: expected max deviation is a few 1e-3 over 8 recurrent steps.
    err_h = float(jnp.max(jnp.abs(hidden - ref_h)))
    err_c = float(jnp.max(jnp.abs(cell - ref_c)))
    assert jnp.allclose(hidden, ref_h, atol=1e-2, rtol=1e-2), err_h
    assert jnp.allclose(cell, ref_c, atol=1e-2, rtol=1e-2), err_c

    print("KERNEL_OK")
</pallas_src>

<mosaic_0001>
module attributes {stable_mosaic.version = 11 : i64} {
  func.func @kernel(%arg0: memref<64x16xf32, #tpu.memory_space<vmem>>, %arg1: memref<128x16xf32, #tpu.memory_space<vmem>>, %arg2: memref<128x32xf32, #tpu.memory_space<vmem>>, %arg3: memref<1x128xf32, #tpu.memory_space<vmem>>, %arg4: memref<1x128xf32, #tpu.memory_space<vmem>>, %arg5: memref<4x32xf32, #tpu.memory_space<vmem>>, %arg6: memref<4x32xf32, #tpu.memory_space<vmem>>) attributes {dimension_semantics = [], scalar_prefetch = 0 : i64, scratch_operands = 0 : i64, tpu.core_type = #tpu.core_type<tc>} {
    %0 = tpu.iota {dimensions = array<i32: 0>} : vector<128x16xi32>
    %1 = tpu.iota {dimensions = array<i32: 0>} : vector<128x32xi32>
    %2 = tpu.iota {dimensions = array<i32: 1>} : vector<8x128xi32>
    %c0 = arith.constant 0 : index
    %c0_0 = arith.constant 0 : index
    %3 = vector.load %arg1[%c0, %c0_0] : memref<128x16xf32, #tpu.memory_space<vmem>>, vector<128x16xf32>
    %c0_1 = arith.constant 0 : index
    %c0_2 = arith.constant 0 : index
    %4 = vector.load %arg2[%c0_1, %c0_2] : memref<128x32xf32, #tpu.memory_space<vmem>>, vector<128x32xf32>
    %c64_i32 = arith.constant 64 : i32
    %5 = vector.broadcast %c64_i32 : i32 to vector<128x16xi32>
    %6 = arith.cmpi sge, %0, %5 : vector<128x16xi32>
    %c96_i32 = arith.constant 96 : i32
    %7 = vector.broadcast %c96_i32 : i32 to vector<128x16xi32>
    %8 = arith.cmpi slt, %0, %7 : vector<128x16xi32>
    %9 = arith.andi %6, %8 : vector<128x16xi1>
    %cst = arith.constant 5.000000e-01 : f32
    %10 = vector.broadcast %cst : f32 to vector<128x16xf32>
    %11 = arith.mulf %10, %3 : vector<128x16xf32>
    %12 = arith.select %9, %3, %11 : vector<128x16xi1>, vector<128x16xf32>
    %13 = arith.truncf %12 : vector<128x16xf32> to vector<128x16xbf16>
    %c64_i32_3 = arith.constant 64 : i32
    %14 = vector.broadcast %c64_i32_3 : i32 to vector<128x32xi32>
    %15 = arith.cmpi sge, %1, %14 : vector<128x32xi32>
    %c96_i32_4 = arith.constant 96 : i32
    %16 = vector.broadcast %c96_i32_4 : i32 to vector<128x32xi32>
    %17 = arith.cmpi slt, %1, %16 : vector<128x32xi32>
    %18 = arith.andi %15, %17 : vector<128x32xi1>
    %cst_5 = arith.constant 5.000000e-01 : f32
    %19 = vector.broadcast %cst_5 : f32 to vector<128x32xf32>
    %20 = arith.mulf %19, %4 : vector<128x32xf32>
    %21 = arith.select %18, %4, %20 : vector<128x32xi1>, vector<128x32xf32>
    %22 = arith.truncf %21 : vector<128x32xf32> to vector<128x32xbf16>
    %c0_6 = arith.constant 0 : index
    %c0_7 = arith.constant 0 : index
    %23 = vector.load %arg3[%c0_6, %c0_7] : memref<1x128xf32, #tpu.memory_space<vmem>>, vector<1x128xf32>
    %c0_8 = arith.constant 0 : index
    %c0_9 = arith.constant 0 : index
    %24 = vector.load %arg4[%c0_8, %c0_9] : memref<1x128xf32, #tpu.memory_space<vmem>>, vector<1x128xf32>
    %25 = arith.addf %23, %24 : vector<1x128xf32>
    %26 = vector.extract_strided_slice %2 {offsets = [0, 0], sizes = [1, 128], strides = [1, 1]} : vector<8x128xi32> to vector<1x128xi32>
    %c64_i32_10 = arith.constant 64 : i32
    %27 = vector.broadcast %c64_i32_10 : i32 to vector<1x128xi32>
    %28 = arith.cmpi sge, %26, %27 : vector<1x128xi32>
    %c96_i32_11 = arith.constant 96 : i32
    %29 = vector.broadcast %c96_i32_11 : i32 to vector<1x128xi32>
    %30 = arith.cmpi slt, %26, %29 : vector<1x128xi32>
    %31 = arith.andi %28, %30 : vector<1x128xi1>
    %cst_12 = arith.constant 5.000000e-01 : f32
    %32 = vector.broadcast %cst_12 : f32 to vector<1x128xf32>
    %33 = arith.mulf %32, %25 : vector<1x128xf32>
    %34 = arith.select %31, %25, %33 : vector<1x128xi1>, vector<1x128xf32>
    %c64_i32_13 = arith.constant 64 : i32
    %35 = vector.broadcast %c64_i32_13 : i32 to vector<8x128xi32>
    %36 = arith.cmpi sge, %2, %35 : vector<8x128xi32>
    %c96_i32_14 = arith.constant 96 : i32
    %37 = vector.broadcast %c96_i32_14 : i32 to vector<8x128xi32>
    %38 = arith.cmpi slt, %2, %37 : vector<8x128xi32>
    %39 = arith.andi %36, %38 : vector<8x128xi1>
    %cst_15 = arith.constant 1.000000e+00 : f32
    %cst_16 = arith.constant 5.000000e-01 : f32
    %40 = vector.broadcast %cst_15 : f32 to vector<8x128xf32>
    %41 = vector.broadcast %cst_16 : f32 to vector<8x128xf32>
    %42 = arith.select %39, %40, %41 : vector<8x128xi1>, vector<8x128xf32>
    %c64_i32_17 = arith.constant 64 : i32
    %43 = vector.broadcast %c64_i32_17 : i32 to vector<8x128xi32>
    %44 = arith.cmpi sge, %2, %43 : vector<8x128xi32>
    %c96_i32_18 = arith.constant 96 : i32
    %45 = vector.broadcast %c96_i32_18 : i32 to vector<8x128xi32>
    %46 = arith.cmpi slt, %2, %45 : vector<8x128xi32>
    %47 = arith.andi %44, %46 : vector<8x128xi1>
    %cst_19 = arith.constant 0.000000e+00 : f32
    %cst_20 = arith.constant 5.000000e-01 : f32
    %48 = vector.broadcast %cst_19 : f32 to vector<8x128xf32>
    %49 = vector.broadcast %cst_20 : f32 to vector<8x128xf32>
    %50 = arith.select %47, %48, %49 : vector<8x128xi1>, vector<8x128xf32>
    %c0_21 = arith.constant 0 : index
    %c0_22 = arith.constant 0 : index
    %51 = vector.load %arg0[%c0_21, %c0_22] : memref<64x16xf32, #tpu.memory_space<vmem>>, vector<64x16xf32>
    %52 = arith.truncf %51 : vector<64x16xf32> to vector<64x16xbf16>
    %cst_23 = arith.constant dense<0.000000e+00> : vector<64x128xf32>
    %53 = tpu.matmul %52, %13, %cst_23 {dimension_numbers = #tpu.dot_dimension_numbers<[1], [1], [0], [0], [0, 0, 1, 0], [], []>} : vector<64x16xbf16>, vector<128x16xbf16>, vector<64x128xf32> -> vector<64x128xf32>
    %54 = vector.broadcast %34 : vector<1x128xf32> to vector<64x128xf32>
    %55 = arith.addf %53, %54 : vector<64x128xf32>
    %cst_24 = arith.constant 0.000000e+00 : f32
    %56 = vector.broadcast %cst_24 : f32 to vector<8x32xf32>
    %cst_25 = arith.constant 0.000000e+00 : f32
    %57 = vector.broadcast %cst_25 : f32 to vector<8x32xf32>
    %58 = arith.truncf %56 : vector<8x32xf32> to vector<8x32xbf16>
    %cst_26 = arith.constant dense<0.000000e+00> : vector<8x128xf32>
    %59 = tpu.matmul %58, %22, %cst_26 {dimension_numbers = #tpu.dot_dimension_numbers<[1], [1], [0], [0], [0, 0, 1, 0], [], []>} : vector<8x32xbf16>, vector<128x32xbf16>, vector<8x128xf32> -> vector<8x128xf32>
    %60 = vector.extract_strided_slice %55 {offsets = [0, 0], sizes = [8, 128], strides = [1, 1]} : vector<64x128xf32> to vector<8x128xf32>
    %61 = arith.addf %60, %59 : vector<8x128xf32>
    %62 = math.tanh %61 : vector<8x128xf32>
    %63 = arith.mulf %62, %42 : vector<8x128xf32>
    %64 = arith.addf %63, %50 : vector<8x128xf32>
    %65 = vector.extract_strided_slice %64 {offsets = [0, 0], sizes = [8, 32], strides = [1, 1]} : vector<8x128xf32> to vector<8x32xf32>
    %66 = vector.extract_strided_slice %64 {offsets = [0, 32], sizes = [8, 32], strides = [1, 1]} : vector<8x128xf32> to vector<8x32xf32>
    %67 = vector.extract_strided_slice %64 {offsets = [0, 64], sizes = [8, 32], strides = [1, 1]} : vector<8x128xf32> to vector<8x32xf32>
    %68 = vector.extract_strided_slice %64 {offsets = [0, 96], sizes = [8, 32], strides = [1, 1]} : vector<8x128xf32> to vector<8x32xf32>
    %69 = arith.mulf %66, %57 : vector<8x32xf32>
    %70 = arith.mulf %65, %67 : vector<8x32xf32>
    %71 = arith.addf %69, %70 : vector<8x32xf32>
    %72 = math.tanh %71 : vector<8x32xf32>
    %73 = arith.mulf %68, %72 : vector<8x32xf32>
    %74 = arith.truncf %73 : vector<8x32xf32> to vector<8x32xbf16>
    %cst_27 = arith.constant dense<0.000000e+00> : vector<8x128xf32>
    %75 = tpu.matmul %74, %22, %cst_27 {dimension_numbers = #tpu.dot_dimension_numbers<[1], [1], [0], [0], [0, 0, 1, 0], [], []>} : vector<8x32xbf16>, vector<128x32xbf16>, vector<8x128xf32> -> vector<8x128xf32>
    %76 = vector.extract_strided_slice %55 {offsets = [8, 0], sizes = [8, 128], strides = [1, 1]} : vector<64x128xf32> to vector<8x128xf32>
    %77 = arith.addf %76, %75 : vector<8x128xf32>
    %78 = math.tanh %77 : vector<8x128xf32>
    %79 = arith.mulf %78, %42 : vector<8x128xf32>
    %80 = arith.addf %79, %50 : vector<8x128xf32>
    %81 = vector.extract_strided_slice %80 {offsets = [0, 0], sizes = [8, 32], strides = [1, 1]} : vector<8x128xf32> to vector<8x32xf32>
    %82 = vector.extract_strided_slice %80 {offsets = [0, 32], sizes = [8, 32], strides = [1, 1]} : vector<8x128xf32> to vector<8x32xf32>
    %83 = vector.extract_strided_slice %80 {offsets = [0, 64], sizes = [8, 32], strides = [1, 1]} : vector<8x128xf32> to vector<8x32xf32>
    %84 = vector.extract_strided_slice %80 {offsets = [0, 96], sizes = [8, 32], strides = [1, 1]} : vector<8x128xf32> to vector<8x32xf32>
    %85 = arith.mulf %82, %71 : vector<8x32xf32>
    %86 = arith.mulf %81, %83 : vector<8x32xf32>
    %87 = arith.addf %85, %86 : vector<8x32xf32>
    %88 = math.tanh %87 : vector<8x32xf32>
    %89 = arith.mulf %84, %88 : vector<8x32xf32>
    %90 = arith.truncf %89 : vector<8x32xf32> to vector<8x32xbf16>
    %cst_28 = arith.constant dense<0.000000e+00> : vector<8x128xf32>
    %91 = tpu.matmul %90, %22, %cst_28 {dimension_numbers = #tpu.dot_dimension_numbers<[1], [1], [0], [0], [0, 0, 1, 0], [], []>} : vector<8x32xbf16>, vector<128x32xbf16>, vector<8x128xf32> -> vector<8x128xf32>
    %92 = vector.extract_strided_slice %55 {offsets = [16, 0], sizes = [8, 128], strides = [1, 1]} : vector<64x128xf32> to vector<8x128xf32>
    %93 = arith.addf %92, %91 : vector<8x128xf32>
    %94 = math.tanh %93 : vector<8x128xf32>
    %95 = arith.mulf %94, %42 : vector<8x128xf32>
    %96 = arith.addf %95, %50 : vector<8x128xf32>
    %97 = vector.extract_strided_slice %96 {offsets = [0, 0], sizes = [8, 32], strides = [1, 1]} : vector<8x128xf32> to vector<8x32xf32>
    %98 = vector.extract_strided_slice %96 {offsets = [0, 32], sizes = [8, 32], strides = [1, 1]} : vector<8x128xf32> to vector<8x32xf32>
    %99 = vector.extract_strided_slice %96 {offsets = [0, 64], sizes = [8, 32], strides = [1, 1]} : vector<8x128xf32> to vector<8x32xf32>
    %100 = vector.extract_strided_slice %96 {offsets = [0, 96], sizes = [8, 32], strides = [1, 1]} : vector<8x128xf32> to vector<8x32xf32>
    %101 = arith.mulf %98, %87 : vector<8x32xf32>
    %102 = arith.mulf %97, %99 : vector<8x32xf32>
    %103 = arith.addf %101, %102 : vector<8x32xf32>
    %104 = math.tanh %103 : vector<8x32xf32>
    %105 = arith.mulf %100, %104 : vector<8x32xf32>
    %106 = arith.truncf %105 : vector<8x32xf32> to vector<8x32xbf16>
    %cst_29 = arith.constant dense<0.000000e+00> : vector<8x128xf32>
    %107 = tpu.matmul %106, %22, %cst_29 {dimension_numbers = #tpu.dot_dimension_numbers<[1], [1], [0], [0], [0, 0, 1, 0], [], []>} : vector<8x32xbf16>, vector<128x32xbf16>, vector<8x128xf32> -> vector<8x128xf32>
    %108 = vector.extract_strided_slice %55 {offsets = [24, 0], sizes = [8, 128], strides = [1, 1]} : vector<64x128xf32> to vector<8x128xf32>
    %109 = arith.addf %108, %107 : vector<8x128xf32>
    %110 = math.tanh %109 : vector<8x128xf32>
    %111 = arith.mulf %110, %42 : vector<8x128xf32>
    %112 = arith.addf %111, %50 : vector<8x128xf32>
    %113 = vector.extract_strided_slice %112 {offsets = [0, 0], sizes = [8, 32], strides = [1, 1]} : vector<8x128xf32> to vector<8x32xf32>
    %114 = vector.extract_strided_slice %112 {offsets = [0, 32], sizes = [8, 32], strides = [1, 1]} : vector<8x128xf32> to vector<8x32xf32>
    %115 = vector.extract_strided_slice %112 {offsets = [0, 64], sizes = [8, 32], strides = [1, 1]} : vector<8x128xf32> to vector<8x32xf32>
    %116 = vector.extract_strided_slice %112 {offsets = [0, 96], sizes = [8, 32], strides = [1, 1]} : vector<8x128xf32> to vector<8x32xf32>
    %117 = arith.mulf %114, %103 : vector<8x32xf32>
    %118 = arith.mulf %113, %115 : vector<8x32xf32>
    %119 = arith.addf %117, %118 : vector<8x32xf32>
    %120 = math.tanh %119 : vector<8x32xf32>
    %121 = arith.mulf %116, %120 : vector<8x32xf32>
    %122 = arith.truncf %121 : vector<8x32xf32> to vector<8x32xbf16>
    %cst_30 = arith.constant dense<0.000000e+00> : vector<8x128xf32>
    %123 = tpu.matmul %122, %22, %cst_30 {dimension_numbers = #tpu.dot_dimension_numbers<[1], [1], [0], [0], [0, 0, 1, 0], [], []>} : vector<8x32xbf16>, vector<128x32xbf16>, vector<8x128xf32> -> vector<8x128xf32>
    %124 = vector.extract_strided_slice %55 {offsets = [32, 0], sizes = [8, 128], strides = [1, 1]} : vector<64x128xf32> to vector<8x128xf32>
    %125 = arith.addf %124, %123 : vector<8x128xf32>
    %126 = math.tanh %125 : vector<8x128xf32>
    %127 = arith.mulf %126, %42 : vector<8x128xf32>
    %128 = arith.addf %127, %50 : vector<8x128xf32>
    %129 = vector.extract_strided_slice %128 {offsets = [0, 0], sizes = [8, 32], strides = [1, 1]} : vector<8x128xf32> to vector<8x32xf32>
    %130 = vector.extract_strided_slice %128 {offsets = [0, 32], sizes = [8, 32], strides = [1, 1]} : vector<8x128xf32> to vector<8x32xf32>
    %131 = vector.extract_strided_slice %128 {offsets = [0, 64], sizes = [8, 32], strides = [1, 1]} : vector<8x128xf32> to vector<8x32xf32>
    %132 = vector.extract_strided_slice %128 {offsets = [0, 96], sizes = [8, 32], strides = [1, 1]} : vector<8x128xf32> to vector<8x32xf32>
    %133 = arith.mulf %130, %119 : vector<8x32xf32>
    %134 = arith.mulf %129, %131 : vector<8x32xf32>
    %135 = arith.addf %133, %134 : vector<8x32xf32>
    %136 = math.tanh %135 : vector<8x32xf32>
    %137 = arith.mulf %132, %136 : vector<8x32xf32>
    %138 = arith.truncf %137 : vector<8x32xf32> to vector<8x32xbf16>
    %cst_31 = arith.constant dense<0.000000e+00> : vector<8x128xf32>
    %139 = tpu.matmul %138, %22, %cst_31 {dimension_numbers = #tpu.dot_dimension_numbers<[1], [1], [0], [0], [0, 0, 1, 0], [], []>} : vector<8x32xbf16>, vector<128x32xbf16>, vector<8x128xf32> -> vector<8x128xf32>
    %140 = vector.extract_strided_slice %55 {offsets = [40, 0], sizes = [8, 128], strides = [1, 1]} : vector<64x128xf32> to vector<8x128xf32>
    %141 = arith.addf %140, %139 : vector<8x128xf32>
    %142 = math.tanh %141 : vector<8x128xf32>
    %143 = arith.mulf %142, %42 : vector<8x128xf32>
    %144 = arith.addf %143, %50 : vector<8x128xf32>
    %145 = vector.extract_strided_slice %144 {offsets = [0, 0], sizes = [8, 32], strides = [1, 1]} : vector<8x128xf32> to vector<8x32xf32>
    %146 = vector.extract_strided_slice %144 {offsets = [0, 32], sizes = [8, 32], strides = [1, 1]} : vector<8x128xf32> to vector<8x32xf32>
    %147 = vector.extract_strided_slice %144 {offsets = [0, 64], sizes = [8, 32], strides = [1, 1]} : vector<8x128xf32> to vector<8x32xf32>
    %148 = vector.extract_strided_slice %144 {offsets = [0, 96], sizes = [8, 32], strides = [1, 1]} : vector<8x128xf32> to vector<8x32xf32>
    %149 = arith.mulf %146, %135 : vector<8x32xf32>
    %150 = arith.mulf %145, %147 : vector<8x32xf32>
    %151 = arith.addf %149, %150 : vector<8x32xf32>
    %152 = math.tanh %151 : vector<8x32xf32>
    %153 = arith.mulf %148, %152 : vector<8x32xf32>
    %154 = arith.truncf %153 : vector<8x32xf32> to vector<8x32xbf16>
    %cst_32 = arith.constant dense<0.000000e+00> : vector<8x128xf32>
    %155 = tpu.matmul %154, %22, %cst_32 {dimension_numbers = #tpu.dot_dimension_numbers<[1], [1], [0], [0], [0, 0, 1, 0], [], []>} : vector<8x32xbf16>, vector<128x32xbf16>, vector<8x128xf32> -> vector<8x128xf32>
    %156 = vector.extract_strided_slice %55 {offsets = [48, 0], sizes = [8, 128], strides = [1, 1]} : vector<64x128xf32> to vector<8x128xf32>
    %157 = arith.addf %156, %155 : vector<8x128xf32>
    %158 = math.tanh %157 : vector<8x128xf32>
    %159 = arith.mulf %158, %42 : vector<8x128xf32>
    %160 = arith.addf %159, %50 : vector<8x128xf32>
    %161 = vector.extract_strided_slice %160 {offsets = [0, 0], sizes = [8, 32], strides = [1, 1]} : vector<8x128xf32> to vector<8x32xf32>
    %162 = vector.extract_strided_slice %160 {offsets = [0, 32], sizes = [8, 32], strides = [1, 1]} : vector<8x128xf32> to vector<8x32xf32>
    %163 = vector.extract_strided_slice %160 {offsets = [0, 64], sizes = [8, 32], strides = [1, 1]} : vector<8x128xf32> to vector<8x32xf32>
    %164 = vector.extract_strided_slice %160 {offsets = [0, 96], sizes = [8, 32], strides = [1, 1]} : vector<8x128xf32> to vector<8x32xf32>
    %165 = arith.mulf %162, %151 : vector<8x32xf32>
    %166 = arith.mulf %161, %163 : vector<8x32xf32>
    %167 = arith.addf %165, %166 : vector<8x32xf32>
    %168 = math.tanh %167 : vector<8x32xf32>
    %169 = arith.mulf %164, %168 : vector<8x32xf32>
    %170 = arith.truncf %169 : vector<8x32xf32> to vector<8x32xbf16>
    %cst_33 = arith.constant dense<0.000000e+00> : vector<8x128xf32>
    %171 = tpu.matmul %170, %22, %cst_33 {dimension_numbers = #tpu.dot_dimension_numbers<[1], [1], [0], [0], [0, 0, 1, 0], [], []>} : vector<8x32xbf16>, vector<128x32xbf16>, vector<8x128xf32> -> vector<8x128xf32>
    %172 = vector.extract_strided_slice %55 {offsets = [56, 0], sizes = [8, 128], strides = [1, 1]} : vector<64x128xf32> to vector<8x128xf32>
    %173 = arith.addf %172, %171 : vector<8x128xf32>
    %174 = math.tanh %173 : vector<8x128xf32>
    %175 = arith.mulf %174, %42 : vector<8x128xf32>
    %176 = arith.addf %175, %50 : vector<8x128xf32>
    %177 = vector.extract_strided_slice %176 {offsets = [0, 0], sizes = [8, 32], strides = [1, 1]} : vector<8x128xf32> to vector<8x32xf32>
    %178 = vector.extract_strided_slice %176 {offsets = [0, 32], sizes = [8, 32], strides = [1, 1]} : vector<8x128xf32> to vector<8x32xf32>
    %179 = vector.extract_strided_slice %176 {offsets = [0, 64], sizes = [8, 32], strides = [1, 1]} : vector<8x128xf32> to vector<8x32xf32>
    %180 = vector.extract_strided_slice %176 {offsets = [0, 96], sizes = [8, 32], strides = [1, 1]} : vector<8x128xf32> to vector<8x32xf32>
    %181 = arith.mulf %178, %167 : vector<8x32xf32>
    %182 = arith.mulf %177, %179 : vector<8x32xf32>
    %183 = arith.addf %181, %182 : vector<8x32xf32>
    %184 = math.tanh %183 : vector<8x32xf32>
    %185 = arith.mulf %180, %184 : vector<8x32xf32>
    %186 = vector.extract_strided_slice %185 {offsets = [0, 0], sizes = [4, 32], strides = [1, 1]} : vector<8x32xf32> to vector<4x32xf32>
    %c0_34 = arith.constant 0 : index
    %c0_35 = arith.constant 0 : index
    %187 = vector.load %arg5[%c0_34, %c0_35] : memref<4x32xf32, #tpu.memory_space<vmem>>, vector<4x32xf32>
    tpu.vector_store %arg5[%c0_34, %c0_35], %186 {strides = array<i32>} : memref<4x32xf32, #tpu.memory_space<vmem>>, vector<4x32xf32>,
    %188 = vector.extract_strided_slice %183 {offsets = [0, 0], sizes = [4, 32], strides = [1, 1]} : vector<8x32xf32> to vector<4x32xf32>
    %c0_36 = arith.constant 0 : index
    %c0_37 = arith.constant 0 : index
    %189 = vector.load %arg6[%c0_36, %c0_37] : memref<4x32xf32, #tpu.memory_space<vmem>>, vector<4x32xf32>
    tpu.vector_store %arg6[%c0_36, %c0_37], %188 {strides = array<i32>} : memref<4x32xf32, #tpu.memory_space<vmem>>, vector<4x32xf32>,
    return
  }
}

</mosaic_0001>

<bundles_post_ra>
// kernel: encoder_lstm_forward.1
= control target key start
LH: loop header
LB: loop body
LE: loop exit
PB: predicated region body
PF: predicated region fallthrough
CT: control target
= control target key end

     0   :  { %12 = vsyncpa [#allocation3], 0  ;;  %v1312_v5 = vmov 0.0   ;;  %vm230_vm0 = vcmask 130048   ;;  %vm332_vm1 = vcmask 261120   ;;  %s1793_s0 = inlined_call_operand.vmem [shape: f32[64,16], index: 0, kind: input, shape index: {}]   ;;  %s1794_s1 = inlined_call_operand.vmem [shape: f32[128,16], index: 1, kind: input, shape index: {}]   ;;  %s1795_s2 = inlined_call_operand.vmem [shape: f32[128,32], index: 2, kind: input, shape index: {}]   ;;  %s1796_s3 = inlined_call_operand.vmem [shape: f32[1,128], index: 3, kind: input, shape index: {}]   ;;  %s1797_s4 = inlined_call_operand.vmem [shape: f32[1,128], index: 4, kind: input, shape index: {}]   ;;  %s1798_s5 = inlined_call_operand.hbm [shape: f32[4,32], index: 5, kind: output, shape index: {0}]   ;;  %s1799_s6 = inlined_call_operand.hbm [shape: f32[4,32], index: 6, kind: output, shape index: {1}]  }
   0x1   :  { %v44_v0 = vld [vmem:[%s1794_s1] sm:$0xff]  ;;  %v45_v1 = vld [vmem:[%s1794_s1 + $0x8] sm:$0xff]  ;;  %1055 = vmatprep.subr.bf16.mxu1 %v1312_v5  ;;  %v46_v8 = vld [vmem:[%s1794_s1 + $0x10] sm:$0xff] }
   0x2   :  { %v60_v2 = vld [vmem:[%s1795_s2] sm:$0xff]  ;;  %v124_v3 = vmul.f32 0.5, %v44_v0  ;;  %v125_v4 = vmul.f32 0.5, %v45_v1  ;;  %v61_v6 = vld [vmem:[%s1795_s2 + $0x8] sm:$0xff]  ;;  %v47_v9 = vld [vmem:[%s1794_s1 + $0x18] sm:$0xff]  ;;  %v126_v11 = vmul.f32 0.5, %v46_v8 }
   0x3   :  { %v164_v7 = vmul.f32 0.5, %v60_v2  ;;  %v165_v10 = vmul.f32 0.5, %v61_v6  ;;  %v127_v12 = vmul.f32 0.5, %v47_v9  ;;  %v62_v13 = vld [vmem:[%s1795_s2 + $0x10] sm:$0xff]  ;;  %v63_v14 = vld [vmem:[%s1795_s2 + $0x18] sm:$0xff]  ;;  %v48_v20 = vld [vmem:[%s1794_s1 + $0x20] sm:$0xff] }
   0x4   :  { %v156_v15 = vpack.c.bf16 %v125_v4, %v124_v3  ;;  %v166_v18 = vmul.f32 0.5, %v62_v13  ;;  %v167_v19 = vmul.f32 0.5, %v63_v14  ;;  %v49_v21 = vld [vmem:[%s1794_s1 + $0x28] sm:$0xff]  ;;  %v128_v24 = vmul.f32 0.5, %v48_v20  ;;  %v64_v27 = vld [vmem:[%s1795_s2 + $0x20] sm:$0xff]  ;;  %v50_v36 = vld [vmem:[%s1794_s1 + $0x30] sm:$0xff] }
   0x5   :  { %v196_v16 = vpack.c.bf16 %v165_v10, %v164_v7  ;;  %v157_v17 = vpack.c.bf16 %v127_v12, %v126_v11  ;;  %v129_v25 = vmul.f32 0.5, %v49_v21  ;;  %v65_v28 = vld [vmem:[%s1795_s2 + $0x28] sm:$0xff]  ;;  %v214_v31 = vld [vmem:[%s1793_s0] sm:$0xff]  ;;  %v168_v34 = vmul.f32 0.5, %v64_v27  ;;  %v51_v37 = vld [vmem:[%s1794_s1 + $0x38] sm:$0xff] }
   0x6   :  { %1215 = vmatprep.subr.msk.bf16.mxu0 %vm230_vm0, %v156_v15  ;;  %v244_v22 = vsel %vm230_vm0, %v156_v15, 0  ;;  %v197_v26 = vpack.c.bf16 %v167_v19, %v166_v18  ;;  %v215_v32 = vld [vmem:[%s1793_s0 + $0x8] sm:$0xff]  ;;  %v169_v35 = vmul.f32 0.5, %v65_v28 }
   0x7   :  { %1032 = vmatpush3.bf16.xpose.msra.mxu0 %v244_v22  ;;  %v1390_v23 = vsel %vm332_vm1, %v196_v16, 0  ;;  %v247_v29 = vsel %vm230_vm0, %v157_v17, 0  ;;  %v158_v30 = vpack.c.bf16 %v129_v25, %v128_v24  ;;  %v222_v38 = vpack.c.bf16 %v215_v32, %v214_v31 }
   0x8   :  { %1056 = vmatpush3.bf16.xpose.msra.mxu1 %v1390_v23  ;;  %1216 = vmatprep.subr.msk.bf16.mxu0 %vm230_vm0, %v157_v17  ;;  %v1409_v33 = vsel %vm332_vm1, %v197_v26, 0 }
   0x9   :  { %1057 = vmatprep.subr.bf16.mxu1 %v1312_v5 }
   0xf   :  { %1034 = vmatpush3.bf16.xpose.msra.mxu0 %v247_v29 }
  0x10   :  { %13 = vsyncpa [#allocation5], 0  ;;  %1058 = vmatpush3.bf16.xpose.msra.mxu1 %v1409_v33  ;;  %1217 = vmatprep.subr.msk.bf16.mxu0 %vm230_vm0, %v158_v30  ;;  %v130_v39 = vmul.f32 0.5, %v50_v36  ;;  %v131_v40 = vmul.f32 0.5, %v51_v37  ;;  %v198_v41 = vpack.c.bf16 %v169_v35, %v168_v34  ;;  %v66_v42 = vld [vmem:[%s1795_s2 + $0x30] sm:$0xff]  ;;  %v67_v43 = vld [vmem:[%s1795_s2 + $0x38] sm:$0xff]  ;;  %v42_v35 = vlaneseq }
  0x11   :  { %1059 = vmatprep.subr.bf16.mxu1 %v1312_v5  ;;  %1047 = vmatprep.mubr.msk.bf16.mxu0 %vm230_vm0, %v222_v38  ;;  %vm1313_vm2 = vmmov 0   ;;  %v250_v44 = vsel %vm230_vm0, %v158_v30, 0  ;;  %v170_v47 = vmul.f32 0.5, %v66_v42  ;;  %v171_v48 = vmul.f32 0.5, %v67_v43  ;;  %v52_v50 = vld [vmem:[%s1794_s1 + $0x40] sm:$0xff]  ;;  %v53_v51 = vld [vmem:[%s1794_s1 + $0x48] sm:$0xff] }
  0x12   :  { %1071 = vmatprep.mubr.msk.bf16.mxu1 %vm1313_vm2, %v1312_v5  ;;  %v159_v45 = vpack.c.bf16 %v131_v40, %v130_v39  ;;  %v1431_v46 = vsel %vm332_vm1, %v198_v41, 0  ;;  %v160_v53 = vpack.c.bf16 %v53_v51, %v52_v50  ;;  %v68_v55 = vld [vmem:[%s1795_s2 + $0x40] sm:$0xff]  ;;  %v69_v56 = vld [vmem:[%s1795_s2 + $0x48] sm:$0xff]  ;;  %v54_v58 = vld [vmem:[%s1794_s1 + $0x50] sm:$0xff]  ;;  %v1314_v34 = vmov 0   ;;  %s1319_s7 = smov [#allocation4]  }
  0x13   :  { %v199_v49 = vpack.c.bf16 %v171_v48, %v170_v47  ;;  %v200_v57 = vpack.c.bf16 %v69_v56, %v68_v55  ;;  %v55_v59 = vld [vmem:[%s1794_s1 + $0x58] sm:$0xff]  ;;  %v56_v63 = vld [vmem:[%s1794_s1 + $0x60] sm:$0xff]  ;;  %v57_v0 = vld [vmem:[%s1794_s1 + $0x68] sm:$0xff]  ;;  %v43_v38 = vand.u32 127, %v42_v35  ;;  %v227_v40 = vshrl.u32 %v42_v35, 7  ;;  %s924_s8 = sshll.u32 %s1319_s7, 4  ;;  %s925_s8 = int_to_ptr.vmem [resolvable:$true] %s924_s8 }
  0x14   :  { %v253_v52 = vsel %vm230_vm0, %v159_v45, 0  ;;  %v256_v60 = vsel %vm230_vm0, %v160_v53, 0  ;;  %v161_v61 = vpack.c.bf16 %v55_v59, %v54_v58  ;;  %v70_v1 = vld [vmem:[%s1795_s2 + $0x50] sm:$0xff]  ;;  %v71_v2 = vld [vmem:[%s1795_s2 + $0x58] sm:$0xff]  ;;  %v136_v3 = vmul.f32 0.5, %v56_v63  ;;  %v72_v7 = vld [vmem:[%s1795_s2 + $0x60] sm:$0xff]  ;;  %p1269_p1 = scmp.lt.s32.totalorder %s925_s8, %s925_s8 }
  0x15   :  { %v1444_v54 = vsel %vm332_vm1, %v199_v49, 0  ;;  %v1463_v62 = vsel %vm332_vm1, %v200_v57, 0  ;;  %v137_v4 = vmul.f32 0.5, %v57_v0  ;;  %v201_v6 = vpack.c.bf16 %v71_v2, %v70_v1  ;;  %v73_v8 = vld [vmem:[%s1795_s2 + $0x68] sm:$0xff]  ;;  %v58_v14 = vld [vmem:[%s1794_s1 + $0x70] sm:$0xff]  ;;  %v59_v15 = vld [vmem:[%s1794_s1 + $0x78] sm:$0xff] }
  0x16   :  { %v259_v9 = vsel %vm230_vm0, %v161_v61, 0  ;;  %v176_v12 = vmul.f32 0.5, %v72_v7  ;;  %v177_v13 = vmul.f32 0.5, %v73_v8  ;;  %v138_v16 = vmul.f32 0.5, %v58_v14  ;;  %v74_v19 = vld [vmem:[%s1795_s2 + $0x70] sm:$0xff]  ;;  %v75_v20 = vld [vmem:[%s1795_s2 + $0x78] sm:$0xff] }
  0x17   :  { %1036 = vmatpush3.bf16.xpose.msra.mxu0 %v250_v44  ;;  %v162_v10 = vpack.c.bf16 %v137_v4, %v136_v3  ;;  %v1488_v11 = vsel %vm332_vm1, %v201_v6, 0  ;;  %v139_v17 = vmul.f32 0.5, %v59_v15  ;;  %v178_v25 = vmul.f32 0.5, %v74_v19  ;;  %v216_v30 = vld [vmem:[%s1793_s0 + $0x10] sm:$0xff]  ;;  %v217_v31 = vld [vmem:[%s1793_s0 + $0x18] sm:$0xff]  ;;  %v218_v7 = vld [vmem:[%s1793_s0 + $0x20] sm:$0xff] }
  0x18   :  { %1060 = vmatpush3.bf16.xpose.msra.mxu1 %v1431_v46  ;;  %1218 = vmatprep.subr.msk.bf16.mxu0 %vm230_vm0, %v159_v45  ;;  %v202_v18 = vpack.c.bf16 %v177_v13, %v176_v12  ;;  %v179_v26 = vmul.f32 0.5, %v75_v20  ;;  %v223_v32 = vpack.c.bf16 %v217_v31, %v216_v30  ;;  %v204_v36 = vld [vmem:[%s1796_s3] sm:$0x1]  ;;  %vm207_vm3 = vcmp.ge.s32.totalorder %v43_v38, 64  ;;  %s1316_s3 = smov 64   ;;  %v219_v8 = vld [vmem:[%s1793_s0 + $0x28] sm:$0xff] }
  0x19   :  { %1061 = vmatprep.subr.bf16.mxu1 %v1312_v5  ;;  %v262_v21 = vsel %vm230_vm0, %v162_v10, 0  ;;  %v163_v22 = vpack.c.bf16 %v139_v17, %v138_v16  ;;  %v205_v37 = vld [vmem:[%s1797_s4] sm:$0x1]  ;;  %vm208_vm4 = vcmp.lt.s32.totalorder %v43_v38, 96  ;;  %v228_v43 = vsub.s32 0, %v227_v40  ;;  %s1317_s4 = smov 32  }
  0x1a   :  { %v1507_v24 = vsel %vm332_vm1, %v202_v18, 0  ;;  %v203_v27 = vpack.c.bf16 %v179_v26, %v178_v25  ;;  %v206_v39 = vadd.f32 %v205_v37, %v204_v36  ;;  %vm1566_vm5 = vmand %vm207_vm3, %vm208_vm4  ;;  %v1315_v58 = vmov 0.5   ;;  %v221_v12 = vld [vmem:[%s1793_s0 + $0x38] sm:$0xff]  ;;  %s1264_s9 = scalar_lea.vmem %s925_s8, 64 }
  0x1b   :  { %v265_v28 = vsel %vm230_vm0, %v163_v22, 0  ;;  %v1581_v59 = vsel %vm1566_vm5, 1.0, %v1315_v58  ;;  %vm901_vm6 = vcmask 257024   ;;  %p1265_p0 = scmp.ne.s32.totalorder %s925_s8, %s1264_s9  ;;  %p1270_p2 = scmp.lt.s32.totalorder %s1264_s9, %s1264_s9 }
  0x1c   :  { %v1514_v29 = vsel %vm332_vm1, %v203_v27, 0  ;;  %v210_v41 = vmul.f32 0.5, %v206_v39 }
  0x1d   :  { %p1271_p3 = por %p1270_p2, %p1269_p1 }
  0x1e   :  { %v211_v44 = vsel %vm1566_vm5, %v206_v39, %v210_v41 }
  0x1f   :  { %1038 = vmatpush3.bf16.xpose.msra.mxu0 %v253_v52  ;;  %v1572_v45 = vrot.slane %v211_v44, %v228_v43  ;;  %p1272_p4 = pnand %p1271_p3, %p1265_p0 }
  0x20   :  { %1062 = vmatpush3.bf16.xpose.msra.mxu1 %v1444_v54  ;;  %1219 = vmatprep.subr.msk.bf16.mxu0 %vm230_vm0, %v160_v53 }
  0x21   :  { %1063 = vmatprep.subr.bf16.mxu1 %v1312_v5 }
  0x27   :  { %1040 = vmatpush3.bf16.xpose.msra.mxu0 %v256_v60 }
  0x28   :  { %1064 = vmatpush3.bf16.xpose.msra.mxu1 %v1463_v62  ;;  %1220 = vmatprep.subr.msk.bf16.mxu0 %vm230_vm0, %v161_v61  ;;  %v1585_v61 = vsel %vm1566_vm5, 0.0, %v1315_v58 }
  0x29   :  { %1065 = vmatprep.subr.bf16.mxu1 %v1312_v5 }
  0x2f   :  { %1042 = vmatpush3.bf16.xpose.msra.mxu0 %v259_v9  ;;  %v220_v9 = vld [vmem:[%s1793_s0 + $0x30] sm:$0xff]  ;;  %s1318_s0 = smov 96  }
  0x30   :  { %1066 = vmatpush3.bf16.xpose.msra.mxu1 %v1488_v11  ;;  %1221 = vmatprep.subr.msk.bf16.mxu0 %vm230_vm0, %v162_v10  ;;  %v224_v10 = vpack.c.bf16 %v219_v8, %v218_v7  ;;  %v225_v13 = vpack.c.bf16 %v221_v12, %v220_v9 }
  0x31   :  { %1067 = vmatprep.subr.bf16.mxu1 %v1312_v5 }
  0x37   :  { %1044 = vmatpush3.bf16.xpose.msra.mxu0 %v262_v21 }
  0x38   :  { %1068 = vmatpush3.bf16.xpose.msra.mxu1 %v1507_v24  ;;  %1222 = vmatprep.subr.msk.bf16.mxu0 %vm230_vm0, %v163_v22 }
  0x39   :  { %1069 = vmatprep.subr.bf16.mxu1 %v1312_v5 }
  0x3f   :  { %1046 = vmatpush3.bf16.xpose.msra.mxu0 %v265_v28 }
  0x40   :  { %1070 = vmatpush3.bf16.xpose.msra.mxu1 %v1514_v29  ;;  %1075 = vmatprep.subr.bf16.mxu0 %v1312_v5 }
  0x41   :  { %1095 = vmatprep.subr.bf16.mxu1 %v1312_v5 }
  0x46   :  { %1048 = vmatmul.mubr.msk.bf16.vlgmr.msra.gmra.mrb[0].mxu0 %vm230_vm0, %v223_v32 }
  0x47   :  { %1072 = vmatmul.mubr.bf16.vlgmr.msra.gmra.mrb[0].mxu1 %v1314_v34  ;;  %1076 = vmatpush3.bf16.xpose.msra.mxu0 %v1390_v23 }
  0x48   :  { %1077 = vmatprep.subr.bf16.mxu0 %v1312_v5  ;;  %1096 = vmatpush3.bf16.xpose.msra.mxu1 %v1390_v23 }
  0x49   :  { %1097 = vmatprep.subr.bf16.mxu1 %v1312_v5  ;;  %1111 = vmatprep.mubr.msk.bf16.mxu1 %vm1313_vm2, %v1312_v5 }
  0x4a   :  { %1051 = vmatprep.mubr.msk.bf16.mxu0 %vm230_vm0, %v224_v10 }
  0x4e   :  { %1052 = vmatmul.mubr.msk.bf16.gmra.mrb[4].mxu0 %vm230_vm0, %v225_v13 }
  0x4f   :  { %1078 = vmatpush3.bf16.xpose.msra.mxu0 %v1409_v33  ;;  %1091 = vmatprep.mubr.msk.bf16.mxu0 %vm1313_vm2, %v1312_v5 }
  0x50   :  { %1079 = vmatprep.subr.bf16.mxu0 %v1312_v5  ;;  %1098 = vmatpush3.bf16.xpose.msra.mxu1 %v1409_v33 }
  0x51   :  { %1099 = vmatprep.subr.bf16.mxu1 %v1312_v5 }
  0x57   :  { %1080 = vmatpush3.bf16.xpose.msra.mxu0 %v1431_v46 }
  0x58   :  { %1081 = vmatprep.subr.bf16.mxu0 %v1312_v5  ;;  %1100 = vmatpush3.bf16.xpose.msra.mxu1 %v1431_v46 }
  0x59   :  { %1101 = vmatprep.subr.bf16.mxu1 %v1312_v5 }
  0x5f   :  { %1082 = vmatpush3.bf16.xpose.msra.mxu0 %v1444_v54 }
  0x60   :  { %1083 = vmatprep.subr.bf16.mxu0 %v1312_v5  ;;  %1102 = vmatpush3.bf16.xpose.msra.mxu1 %v1444_v54 }
  0x61   :  { %1103 = vmatprep.subr.bf16.mxu1 %v1312_v5 }
  0x67   :  { %1084 = vmatpush3.bf16.xpose.msra.mxu0 %v1463_v62 }
  0x68   :  { %1085 = vmatprep.subr.bf16.mxu0 %v1312_v5  ;;  %1104 = vmatpush3.bf16.xpose.msra.mxu1 %v1463_v62 }
  0x69   :  { %1105 = vmatprep.subr.bf16.mxu1 %v1312_v5 }
  0x6f   :  { %1086 = vmatpush3.bf16.xpose.msra.mxu0 %v1488_v11 }
  0x70   :  { %1087 = vmatprep.subr.bf16.mxu0 %v1312_v5  ;;  %1106 = vmatpush3.bf16.xpose.msra.mxu1 %v1488_v11 }
  0x71   :  { %1107 = vmatprep.subr.bf16.mxu1 %v1312_v5 }
  0x77   :  { %1088 = vmatpush3.bf16.xpose.msra.mxu0 %v1507_v24 }
  0x78   :  { %1089 = vmatprep.subr.bf16.mxu0 %v1312_v5  ;;  %1108 = vmatpush3.bf16.xpose.msra.mxu1 %v1507_v24 }
  0x79   :  { %1109 = vmatprep.subr.bf16.mxu1 %v1312_v5 }
  0x7f   :  { %1090 = vmatpush3.bf16.xpose.msra.mxu0 %v1514_v29 }
  0x80   :  { %1110 = vmatpush3.bf16.xpose.msra.mxu1 %v1514_v29  ;;  %1115 = vmatprep.subr.bf16.mxu0 %v1312_v5 }
  0x81   :  { %1135 = vmatprep.subr.bf16.mxu1 %v1312_v5 }
 0x119   :  { %v1574_v47 = vpop.f32.mrb[0].mxu0 }
 0x11a   :  { %v394_v48 = vpop.f32.mrb[0].mxu1  ;;  %v301_v49 = vpop.f32.mrb[1].mxu0 }
 0x11b   :  { %v302_v50 = vadd.f32 %v301_v49, %v1572_v45  ;;  %v1073_v51 = vpop.f32.mrb[1].mxu1  ;;  %v1577_v52 = vpop.f32.mrb[2].mxu0  ;;  %v310_v49 = vadd.f32 %v1574_v47, %v1572_v45 }
 0x11c   :  { %v397_v53 = vpop.f32.mrb[2].mxu1  ;;  %v304_v55 = vpop.f32.mrb[3].mxu0  ;;  %v313_v9 = vadd.f32 %v1577_v52, %v1572_v45 }
 0x11d   :  { %v400_v56 = vadd.f32 %v394_v48, %v302_v50  ;;  %v1074_v57 = vpop.f32.mrb[3].mxu1  ;;  %v305_v25 = vadd.f32 %v304_v55, %v1572_v45 }
 0x11f   :  { %1232 = vtanh.f32 %v400_v56 }
 0x121   :  { %v1609_v18 = vpop.f32.mrb[4].mxu0 }
 0x122   :  { %v1611_v19 = vpop.f32.mrb[5].mxu0 }
 0x123   :  { %v1613_v20 = vpop.f32.mrb[6].mxu0 }
 0x124   :  { %v1615_v21 = vpop.f32.mrb[7].mxu0 }
 0x129   :  { %v1233_v60 = vpop.eup %1232 }
 0x12a   :  { %v402_v63 = vmul.f32 %v1233_v60, %v1581_v59 }
 0x12c   :  { %v403_v0 = vadd.f32 %v402_v63, %v1585_v61 }
 0x12e   :  { %406 = vrot.lane.b32.xlu0 %v403_v0, %s1316_s3  ;;  %v404_v3 = vmul.f32 0.0, %v403_v0 }
 0x1a0   :  { %v407_v1 = vpop.permute.xlu0 %406 }
 0x1a1   :  { %v409_v2 = vmul.f32 %v407_v1, %v403_v0 }
 0x1a3   :  { %411 = vrot.lane.b32.xlu0 %v409_v2, %s1317_s4 }
 0x215   :  { %v412_v4 = vpop.permute.xlu0 %411 }
 0x216   :  { %v414_v6 = vadd.f32 %v412_v4, %v404_v3 }
 0x218   :  { %1234 = vtanh.f32 %v414_v6 }
 0x222   :  { %v1235_v14 = vpop.eup %1234 }
 0x223   :  { %417 = vrot.lane.b32.xlu1 %v1235_v14, %s1316_s3 }
 0x295   :  { %v418_v15 = vpop.permute.xlu1 %417 }
 0x296   :  { %v420_v16 = vmul.f32 %v418_v15, %v403_v0 }
 0x298   :  { %v421_v17 = vpack.c.bf16 %v420_v16, %v420_v16 }
 0x29a   :  { %423 = vrot.lane.b32.xlu1 %v421_v17, %s1317_s4 }
 0x30c   :  { %v424_v22 = vpop.permute.xlu1 %423 }
 0x30d   :  { %1092 = vmatmul.mubr.msk.bf16.vlgmr.msra.gmra.mrb[8].mxu0 %vm332_vm1, %v424_v22 }
 0x30e   :  { %1116 = vmatpush3.bf16.xpose.msra.mxu0 %v1390_v23  ;;  %1131 = vmatprep.mubr.msk.bf16.mxu0 %vm1313_vm2, %v1312_v5 }
 0x30f   :  { %1117 = vmatprep.subr.bf16.mxu0 %v1312_v5 }
 0x316   :  { %1118 = vmatpush3.bf16.xpose.msra.mxu0 %v1409_v33 }
 0x317   :  { %1119 = vmatprep.subr.bf16.mxu0 %v1312_v5 }
 0x31e   :  { %1120 = vmatpush3.bf16.xpose.msra.mxu0 %v1431_v46 }
 0x31f   :  { %1121 = vmatprep.subr.bf16.mxu0 %v1312_v5 }
 0x326   :  { %1122 = vmatpush3.bf16.xpose.msra.mxu0 %v1444_v54 }
 0x327   :  { %1123 = vmatprep.subr.bf16.mxu0 %v1312_v5 }
 0x32e   :  { %1124 = vmatpush3.bf16.xpose.msra.mxu0 %v1463_v62 }
 0x32f   :  { %1125 = vmatprep.subr.bf16.mxu0 %v1312_v5 }
 0x336   :  { %1126 = vmatpush3.bf16.xpose.msra.mxu0 %v1488_v11 }
 0x337   :  { %1127 = vmatprep.subr.bf16.mxu0 %v1312_v5 }
 0x33e   :  { %1128 = vmatpush3.bf16.xpose.msra.mxu0 %v1507_v24 }
 0x33f   :  { %1129 = vmatprep.subr.bf16.mxu0 %v1312_v5 }
 0x346   :  { %1130 = vmatpush3.bf16.xpose.msra.mxu0 %v1514_v29 }
 0x347   :  { %1155 = vmatprep.subr.bf16.mxu0 %v1312_v5 }
 0x3e0   :  { %v462_v26 = vpop.f32.mrb[8].mxu0 }
 0x3e1   :  { %v468_v27 = vadd.f32 %v462_v26, %v305_v25  ;;  %v1093_v28 = vpop.f32.mrb[9].mxu0 }
 0x3e2   :  { %v465_v30 = vpop.f32.mrb[10].mxu0 }
 0x3e3   :  { %1236 = vtanh.f32 %v468_v27  ;;  %v1094_v31 = vpop.f32.mrb[11].mxu0 }
 0x3ed   :  { %v1237_v32 = vpop.eup %1236 }
 0x3ee   :  { %v470_v34 = vmul.f32 %v1237_v32, %v1581_v59 }
 0x3f0   :  { %v471_v35 = vadd.f32 %v470_v34, %v1585_v61 }
 0x3f2   :  { %474 = vrot.lane.b32.xlu0 %v471_v35, %s1316_s3  ;;  %v472_v38 = vmul.f32 %v471_v35, %v414_v6 }
 0x464   :  { %v475_v36 = vpop.permute.xlu0 %474 }
 0x465   :  { %v477_v37 = vmul.f32 %v475_v36, %v471_v35  ;;  %v318_v36 = vadd.f32 %v1611_v19, %v1572_v45 }
 0x467   :  { %479 = vrot.lane.b32.xlu1 %v477_v37, %s1317_s4 }
 0x4d9   :  { %v480_v39 = vpop.permute.xlu1 %479 }
 0x4da   :  { %v482_v40 = vadd.f32 %v480_v39, %v472_v38 }
 0x4dc   :  { %1238 = vtanh.f32 %v482_v40 }
 0x4e6   :  { %v1239_v41 = vpop.eup %1238 }
 0x4e7   :  { %485 = vrot.lane.b32.xlu0 %v1239_v41, %s1316_s3 }
 0x559   :  { %v486_v42 = vpop.permute.xlu0 %485 }
 0x55a   :  { %v488_v43 = vmul.f32 %v486_v42, %v471_v35 }
 0x55c   :  { %v489_v44 = vpack.c.bf16 %v488_v43, %v488_v43 }
 0x55e   :  { %491 = vrot.lane.b32.xlu1 %v489_v44, %s1317_s4 }
 0x5d0   :  { %v492_v48 = vpop.permute.xlu1 %491 }
 0x5d1   :  { %1112 = vmatmul.mubr.msk.bf16.vlgmr.msra.gmra.mrb[4].mxu1 %vm332_vm1, %v492_v48 }
 0x5d2   :  { %1136 = vmatpush3.bf16.xpose.msra.mxu1 %v1390_v23  ;;  %1151 = vmatprep.mubr.msk.bf16.mxu1 %vm1313_vm2, %v1312_v5 }
 0x5d3   :  { %1137 = vmatprep.subr.bf16.mxu1 %v1312_v5 }
 0x5da   :  { %1138 = vmatpush3.bf16.xpose.msra.mxu1 %v1409_v33 }
 0x5db   :  { %1139 = vmatprep.subr.bf16.mxu1 %v1312_v5 }
 0x5e2   :  { %1140 = vmatpush3.bf16.xpose.msra.mxu1 %v1431_v46 }
 0x5e3   :  { %1141 = vmatprep.subr.bf16.mxu1 %v1312_v5 }
 0x5ea   :  { %1142 = vmatpush3.bf16.xpose.msra.mxu1 %v1444_v54 }
 0x5eb   :  { %1143 = vmatprep.subr.bf16.mxu1 %v1312_v5 }
 0x5f2   :  { %1144 = vmatpush3.bf16.xpose.msra.mxu1 %v1463_v62 }
 0x5f3   :  { %1145 = vmatprep.subr.bf16.mxu1 %v1312_v5 }
 0x5fa   :  { %1146 = vmatpush3.bf16.xpose.msra.mxu1 %v1488_v11 }
 0x5fb   :  { %1147 = vmatprep.subr.bf16.mxu1 %v1312_v5 }
 0x602   :  { %1148 = vmatpush3.bf16.xpose.msra.mxu1 %v1507_v24 }
 0x603   :  { %1149 = vmatprep.subr.bf16.mxu1 %v1312_v5 }
 0x60a   :  { %1150 = vmatpush3.bf16.xpose.msra.mxu1 %v1514_v29 }
 0x60b   :  { %1175 = vmatprep.subr.bf16.mxu1 %v1312_v5 }
 0x6a4   :  { %v530_v50 = vpop.f32.mrb[4].mxu1 }
 0x6a5   :  { %v536_v51 = vadd.f32 %v530_v50, %v310_v49  ;;  %v1113_v53 = vpop.f32.mrb[5].mxu1 }
 0x6a6   :  { %v533_v55 = vpop.f32.mrb[6].mxu1 }
 0x6a7   :  { %1240 = vtanh.f32 %v536_v51  ;;  %v1114_v56 = vpop.f32.mrb[7].mxu1 }
 0x6b1   :  { %v1241_v57 = vpop.eup %1240 }
 0x6b2   :  { %v538_v58 = vmul.f32 %v1241_v57, %v1581_v59 }
 0x6b4   :  { %v539_v60 = vadd.f32 %v538_v58, %v1585_v61 }
 0x6b6   :  { %542 = vrot.lane.b32.xlu0 %v539_v60, %s1316_s3  ;;  %v540_v1 = vmul.f32 %v539_v60, %v482_v40 }
 0x728   :  { %v543_v63 = vpop.permute.xlu0 %542 }
 0x729   :  { %v545_v0 = vmul.f32 %v543_v63, %v539_v60 }
 0x72b   :  { %547 = vrot.lane.b32.xlu1 %v545_v0, %s1317_s4 }
 0x79d   :  { %v548_v2 = vpop.permute.xlu1 %547 }
 0x79e   :  { %v550_v47 = vadd.f32 %v548_v2, %v540_v1 }
 0x7a0   :  { %1242 = vtanh.f32 %v550_v47 }
 0x7aa   :  { %v1243_v3 = vpop.eup %1242 }
 0x7ab   :  { %553 = vrot.lane.b32.xlu0 %v1243_v3, %s1316_s3 }
 0x81d   :  { %v554_v4 = vpop.permute.xlu0 %553 }
 0x81e   :  { %v556_v6 = vmul.f32 %v554_v4, %v539_v60 }
 0x820   :  { %v557_v7 = vpack.c.bf16 %v556_v6, %v556_v6 }
 0x822   :  { %559 = vrot.lane.b32.xlu1 %v557_v7, %s1317_s4  ;;  %v326_v7 = vadd.f32 %v1609_v18, %v1572_v45 }
 0x894   :  { %v560_v8 = vpop.permute.xlu1 %559 }
 0x895   :  { %1132 = vmatmul.mubr.msk.bf16.vlgmr.msra.gmra.mrb[12].mxu0 %vm332_vm1, %v560_v8 }
 0x896   :  { %1156 = vmatpush3.bf16.xpose.msra.mxu0 %v1390_v23  ;;  %1171 = vmatprep.mubr.msk.bf16.mxu0 %vm1313_vm2, %v1312_v5 }
 0x897   :  { %1157 = vmatprep.subr.bf16.mxu0 %v1312_v5 }
 0x89e   :  { %1158 = vmatpush3.bf16.xpose.msra.mxu0 %v1409_v33 }
 0x89f   :  { %1159 = vmatprep.subr.bf16.mxu0 %v1312_v5 }
 0x8a6   :  { %1160 = vmatpush3.bf16.xpose.msra.mxu0 %v1431_v46 }
 0x8a7   :  { %1161 = vmatprep.subr.bf16.mxu0 %v1312_v5 }
 0x8ae   :  { %1162 = vmatpush3.bf16.xpose.msra.mxu0 %v1444_v54 }
 0x8af   :  { %1163 = vmatprep.subr.bf16.mxu0 %v1312_v5 }
 0x8b6   :  { %1164 = vmatpush3.bf16.xpose.msra.mxu0 %v1463_v62 }
 0x8b7   :  { %1165 = vmatprep.subr.bf16.mxu0 %v1312_v5 }
 0x8be   :  { %1166 = vmatpush3.bf16.xpose.msra.mxu0 %v1488_v11 }
 0x8bf   :  { %1167 = vmatprep.subr.bf16.mxu0 %v1312_v5 }
 0x8c6   :  { %1168 = vmatpush3.bf16.xpose.msra.mxu0 %v1507_v24 }
 0x8c7   :  { %1169 = vmatprep.subr.bf16.mxu0 %v1312_v5 }
 0x8ce   :  { %1170 = vmatpush3.bf16.xpose.msra.mxu0 %v1514_v29 }
 0x8cf   :  { %1195 = vmatprep.subr.bf16.mxu0 %v1312_v5 }
 0x968   :  { %v598_v10 = vpop.f32.mrb[12].mxu0 }
 0x969   :  { %v604_v12 = vadd.f32 %v598_v10, %v313_v9  ;;  %v1133_v13 = vpop.f32.mrb[13].mxu0 }
 0x96a   :  { %v601_v14 = vpop.f32.mrb[14].mxu0 }
 0x96b   :  { %1244 = vtanh.f32 %v604_v12  ;;  %v1134_v15 = vpop.f32.mrb[15].mxu0 }
 0x975   :  { %v1245_v16 = vpop.eup %1244 }
 0x976   :  { %v606_v17 = vmul.f32 %v1245_v16, %v1581_v59 }
 0x978   :  { %v607_v22 = vadd.f32 %v606_v17, %v1585_v61 }
 0x97a   :  { %610 = vrot.lane.b32.xlu0 %v607_v22, %s1316_s3  ;;  %v608_v27 = vmul.f32 %v607_v22, %v550_v47 }
 0x9ec   :  { %v611_v25 = vpop.permute.xlu0 %610 }
 0x9ed   :  { %v613_v26 = vmul.f32 %v611_v25, %v607_v22 }
 0x9ef   :  { %615 = vrot.lane.b32.xlu1 %v613_v26, %s1317_s4 }
 0xa61   :  { %v616_v28 = vpop.permute.xlu1 %615 }
 0xa62   :  { %v618_v52 = vadd.f32 %v616_v28, %v608_v27 }
 0xa64   :  { %1246 = vtanh.f32 %v618_v52 }
 0xa6e   :  { %v1247_v30 = vpop.eup %1246 }
 0xa6f   :  { %621 = vrot.lane.b32.xlu0 %v1247_v30, %s1316_s3 }
 0xae1   :  { %v622_v31 = vpop.permute.xlu0 %621 }
 0xae2   :  { %v624_v32 = vmul.f32 %v622_v31, %v607_v22 }
 0xae4   :  { %v625_v34 = vpack.c.bf16 %v624_v32, %v624_v32  ;;  %v329_v32 = vadd.f32 %v1613_v20, %v1572_v45 }
 0xae6   :  { %627 = vrot.lane.b32.xlu1 %v625_v34, %s1317_s4 }
 0xb58   :  { %v628_v35 = vpop.permute.xlu1 %627 }
 0xb59   :  { %1152 = vmatmul.mubr.msk.bf16.vlgmr.msra.gmra.mrb[8].mxu1 %vm332_vm1, %v628_v35 }
 0xb5a   :  { %1176 = vmatpush3.bf16.xpose.msra.mxu1 %v1390_v23  ;;  %1191 = vmatprep.mubr.msk.bf16.mxu1 %vm1313_vm2, %v1312_v5 }
 0xb5b   :  { %1177 = vmatprep.subr.bf16.mxu1 %v1312_v5 }
 0xb62   :  { %1178 = vmatpush3.bf16.xpose.msra.mxu1 %v1409_v33 }
 0xb63   :  { %1179 = vmatprep.subr.bf16.mxu1 %v1312_v5 }
 0xb6a   :  { %1180 = vmatpush3.bf16.xpose.msra.mxu1 %v1431_v46 }
 0xb6b   :  { %1181 = vmatprep.subr.bf16.mxu1 %v1312_v5 }
 0xb72   :  { %1182 = vmatpush3.bf16.xpose.msra.mxu1 %v1444_v54 }
 0xb73   :  { %1183 = vmatprep.subr.bf16.mxu1 %v1312_v5 }
 0xb7a   :  { %1184 = vmatpush3.bf16.xpose.msra.mxu1 %v1463_v62 }
 0xb7b   :  { %1185 = vmatprep.subr.bf16.mxu1 %v1312_v5 }
 0xb82   :  { %1186 = vmatpush3.bf16.xpose.msra.mxu1 %v1488_v11 }
 0xb83   :  { %1187 = vmatprep.subr.bf16.mxu1 %v1312_v5 }
 0xb8a   :  { %1188 = vmatpush3.bf16.xpose.msra.mxu1 %v1507_v24 }
 0xb8b   :  { %1189 = vmatprep.subr.bf16.mxu1 %v1312_v5 }
 0xb92   :  { %1190 = vmatpush3.bf16.xpose.msra.mxu1 %v1514_v29 }
 0xc2c   :  { %v666_v37 = vpop.f32.mrb[8].mxu1 }
 0xc2d   :  { %v672_v38 = vadd.f32 %v666_v37, %v318_v36  ;;  %v1153_v39 = vpop.f32.mrb[9].mxu1 }
 0xc2e   :  { %v669_v40 = vpop.f32.mrb[10].mxu1 }
 0xc2f   :  { %1248 = vtanh.f32 %v672_v38  ;;  %v1154_v41 = vpop.f32.mrb[11].mxu1 }
 0xc39   :  { %v1249_v42 = vpop.eup %1248 }
 0xc3a   :  { %v674_v43 = vmul.f32 %v1249_v42, %v1581_v59 }
 0xc3c   :  { %v675_v44 = vadd.f32 %v674_v43, %v1585_v61 }
 0xc3e   :  { %678 = vrot.lane.b32.xlu0 %v675_v44, %s1316_s3  ;;  %v676_v50 = vmul.f32 %v675_v44, %v618_v52 }
 0xcb0   :  { %v679_v48 = vpop.permute.xlu0 %678 }
 0xcb1   :  { %v681_v49 = vmul.f32 %v679_v48, %v675_v44 }
 0xcb3   :  { %683 = vrot.lane.b32.xlu1 %v681_v49, %s1317_s4 }
 0xd25   :  { %v684_v51 = vpop.permute.xlu1 %683 }
 0xd26   :  { %v686_v19 = vadd.f32 %v684_v51, %v676_v50 }
 0xd28   :  { %1250 = vtanh.f32 %v686_v19 }
 0xd32   :  { %v1251_v53 = vpop.eup %1250 }
 0xd33   :  { %689 = vrot.lane.b32.xlu0 %v1251_v53, %s1316_s3 }
 0xda5   :  { %v690_v55 = vpop.permute.xlu0 %689 }
 0xda6   :  { %v692_v56 = vmul.f32 %v690_v55, %v675_v44 }
 0xda8   :  { %v693_v57 = vpack.c.bf16 %v692_v56, %v692_v56 }
 0xdaa   :  { %695 = vrot.lane.b32.xlu1 %v693_v57, %s1317_s4 }
 0xe1c   :  { %v696_v58 = vpop.permute.xlu1 %695 }
 0xe1d   :  { %1172 = vmatmul.mubr.msk.bf16.vlgmr.msra.gmra.mrb[16].mxu0 %vm332_vm1, %v696_v58 }
 0xe1e   :  { %1196 = vmatpush3.bf16.xpose.msra.mxu0 %v1390_v23  ;;  %1211 = vmatprep.mubr.msk.bf16.mxu0 %vm1313_vm2, %v1312_v5  ;;  %v321_v23 = vadd.f32 %v1615_v21, %v1572_v45 }
 0xe1f   :  { %1197 = vmatprep.subr.bf16.mxu0 %v1312_v5 }
 0xe26   :  { %1198 = vmatpush3.bf16.xpose.msra.mxu0 %v1409_v33 }
 0xe27   :  { %1199 = vmatprep.subr.bf16.mxu0 %v1312_v5 }
 0xe2e   :  { %1200 = vmatpush3.bf16.xpose.msra.mxu0 %v1431_v46 }
 0xe2f   :  { %1201 = vmatprep.subr.bf16.mxu0 %v1312_v5 }
 0xe36   :  { %1202 = vmatpush3.bf16.xpose.msra.mxu0 %v1444_v54 }
 0xe37   :  { %1203 = vmatprep.subr.bf16.mxu0 %v1312_v5 }
 0xe3e   :  { %1204 = vmatpush3.bf16.xpose.msra.mxu0 %v1463_v62 }
 0xe3f   :  { %1205 = vmatprep.subr.bf16.mxu0 %v1312_v5 }
 0xe46   :  { %1206 = vmatpush3.bf16.xpose.msra.mxu0 %v1488_v11 }
 0xe47   :  { %1207 = vmatprep.subr.bf16.mxu0 %v1312_v5 }
 0xe4e   :  { %1208 = vmatpush3.bf16.xpose.msra.mxu0 %v1507_v24 }
 0xe4f   :  { %1209 = vmatprep.subr.bf16.mxu0 %v1312_v5 }
 0xe56   :  { %1210 = vmatpush3.bf16.xpose.msra.mxu0 %v1514_v29 }
 0xef0   :  { %v734_v33 = vpop.f32.mrb[16].mxu0 }
 0xef1   :  { %v740_v46 = vadd.f32 %v734_v33, %v321_v23  ;;  %v1173_v54 = vpop.f32.mrb[17].mxu0 }
 0xef2   :  { %v737_v60 = vpop.f32.mrb[18].mxu0 }
 0xef3   :  { %1252 = vtanh.f32 %v740_v46  ;;  %v1174_v62 = vpop.f32.mrb[19].mxu0 }
 0xefd   :  { %v1253_v63 = vpop.eup %1252 }
 0xefe   :  { %v742_v11 = vmul.f32 %v1253_v63, %v1581_v59 }
 0xf00   :  { %v743_v0 = vadd.f32 %v742_v11, %v1585_v61 }
 0xf02   :  { %746 = vrot.lane.b32.xlu0 %v743_v0, %s1316_s3  ;;  %v744_v29 = vmul.f32 %v743_v0, %v686_v19 }
 0xf74   :  { %v747_v24 = vpop.permute.xlu0 %746 }
 0xf75   :  { %v749_v5 = vmul.f32 %v747_v24, %v743_v0 }
 0xf77   :  { %751 = vrot.lane.b32.xlu1 %v749_v5, %s1317_s4 }
 0xfe9   :  { %v752_v1 = vpop.permute.xlu1 %751 }
 0xfea   :  { %v754_v21 = vadd.f32 %v752_v1, %v744_v29 }
 0xfec   :  { %1254 = vtanh.f32 %v754_v21 }
 0xff6   :  { %v1255_v2 = vpop.eup %1254 }
 0xff7   :  { %757 = vrot.lane.b32.xlu0 %v1255_v2, %s1316_s3 }
0x1069   :  { %v758_v47 = vpop.permute.xlu0 %757 }
0x106a   :  { %v760_v3 = vmul.f32 %v758_v47, %v743_v0 }
0x106c   :  { %v761_v4 = vpack.c.bf16 %v760_v3, %v760_v3 }
0x106e   :  { %763 = vrot.lane.b32.xlu1 %v761_v4, %s1317_s4 }
0x10e0   :  { %v764_v6 = vpop.permute.xlu1 %763 }
0x10e1   :  { %1192 = vmatmul.mubr.msk.bf16.vlgmr.msra.gmra.mrb[12].mxu1 %vm332_vm1, %v764_v6 }
0x11b4   :  { %v802_v8 = vpop.f32.mrb[12].mxu1 }
0x11b5   :  { %v808_v9 = vadd.f32 %v802_v8, %v326_v7  ;;  %v1193_v10 = vpop.f32.mrb[13].mxu1 }
0x11b6   :  { %v805_v12 = vpop.f32.mrb[14].mxu1 }
0x11b7   :  { %1256 = vtanh.f32 %v808_v9  ;;  %v1194_v13 = vpop.f32.mrb[15].mxu1 }
0x11c1   :  { %v1257_v14 = vpop.eup %1256 }
0x11c2   :  { %v810_v15 = vmul.f32 %v1257_v14, %v1581_v59 }
0x11c4   :  { %v811_v16 = vadd.f32 %v810_v15, %v1585_v61 }
0x11c6   :  { %814 = vrot.lane.b32.xlu0 %v811_v16, %s1316_s3  ;;  %v812_v25 = vmul.f32 %v811_v16, %v754_v21 }
0x1238   :  { %v815_v17 = vpop.permute.xlu0 %814 }
0x1239   :  { %v817_v22 = vmul.f32 %v815_v17, %v811_v16 }
0x123b   :  { %819 = vrot.lane.b32.xlu1 %v817_v22, %s1317_s4 }
0x12ad   :  { %v820_v26 = vpop.permute.xlu1 %819 }
0x12ae   :  { %v822_v18 = vadd.f32 %v820_v26, %v812_v25 }
0x12b0   :  { %1258 = vtanh.f32 %v822_v18 }
0x12ba   :  { %v1259_v27 = vpop.eup %1258 }
0x12bb   :  { %825 = vrot.lane.b32.xlu0 %v1259_v27, %s1316_s3 }
0x132d   :  { %v826_v28 = vpop.permute.xlu0 %825 }
0x132e   :  { %v828_v52 = vmul.f32 %v826_v28, %v811_v16 }
0x1330   :  { %v829_v30 = vpack.c.bf16 %v828_v52, %v828_v52 }
0x1332   :  { %831 = vrot.lane.b32.xlu1 %v829_v30, %s1317_s4 }
0x13a4   :  { %v832_v31 = vpop.permute.xlu1 %831 }
0x13a5   :  { %1212 = vmatmul.mubr.msk.bf16.vlgmr.msra.gmra.mrb[20].mxu0 %vm332_vm1, %v832_v31 }
0x1478   :  { %v870_v34 = vpop.f32.mrb[20].mxu0 }
0x1479   :  { %v876_v35 = vadd.f32 %v870_v34, %v329_v32  ;;  %v1213_v36 = vpop.f32.mrb[21].mxu0 }
0x147a   :  { %v873_v37 = vpop.f32.mrb[22].mxu0 }
0x147b   :  { %1260 = vtanh.f32 %v876_v35  ;;  %v1214_v38 = vpop.f32.mrb[23].mxu0 }
0x1485   :  { %v1261_v39 = vpop.eup %1260 }
0x1486   :  { %v878_v40 = vmul.f32 %v1261_v39, %v1581_v59 }
0x1488   :  { %v879_v41 = vadd.f32 %v878_v40, %v1585_v61 }
0x148a   :  { %882 = vrot.lane.b32.xlu0 %v879_v41, %s1316_s3  ;;  %v880_v44 = vmul.f32 %v879_v41, %v822_v18 }
0x14fc   :  { %v883_v42 = vpop.permute.xlu0 %882 }
0x14fd   :  { %v885_v43 = vmul.f32 %v883_v42, %v879_v41 }
0x14ff   :  { %887 = vrot.lane.b32.xlu1 %v885_v43, %s1317_s4 }
0x1571   :  { %v888_v48 = vpop.permute.xlu1 %887 }
0x1572   :  { %v890_v45 = vadd.f32 %v888_v48, %v880_v44 }
0x1574   :  { %1262 = vtanh.f32 %v890_v45 }
0x157e   :  { %v1263_v20 = vpop.eup %1262 }
0x157f   :  { %893 = vrot.lane.b32.xlu0 %v1263_v20, %s1316_s3 }
0x1583   :  { %904 = vrot.lane.b32.xlu0 %v890_v45, %s1318_s0 }
0x15f1   :  { %v894_v49 = vpop.permute.xlu0 %893 }
0x15f2   :  { %v896_v59 = vmul.f32 %v894_v49, %v879_v41 }
0x15f4   :  { %898 = vrot.lane.b32.xlu1 %v896_v59, %s1317_s4 }
0x15f5   :  { %v905_v61 = vpop.permute.xlu0 %904 }
0x15f6   :  { %907 = vst.msk [vmem:[#allocation4] sm:$0xf] %vm901_vm6, %v905_v61 }
0x15f7   :  { %1275 = shalt.err (!%p1272_p4)
}
0x15f8   :  { %s1276_s12 = scalar_lea.hbm %s1799_s6, 64 }
0x15f9   :  { %p1277_p5 = scmp.ne.s32.totalorder %s1799_s6, %s1276_s12  ;;  %p1280_p6 = scmp.lt.u32.totalorder %s1276_s12, %s1799_s6 }
0x15fb   :  { %p1282_p7 = pnand %p1280_p6, %p1277_p5 }
0x15fd   :  { %1285 = shalt.err (!%p1282_p7)
}
0x15fe   :  { %927 = dma.vmem_to_hbm [thread:$0]  %s925_s8, 64, %s1799_s6, [#allocation5]  }
0x15ff   :  { %s1320_s17 = smov [#allocation2]  }
0x1600   :  { %s914_s18 = sshll.u32 %s1320_s17, 4  ;;  %s915_s18 = int_to_ptr.vmem [resolvable:$true] %s914_s18 }
0x1601   :  { %s1286_s19 = scalar_lea.vmem %s915_s18, 64  ;;  %p1291_p9 = scmp.lt.s32.totalorder %s915_s18, %s915_s18 }
0x1602   :  { %p1287_p8 = scmp.ne.s32.totalorder %s915_s18, %s1286_s19  ;;  %p1292_p10 = scmp.lt.s32.totalorder %s1286_s19, %s1286_s19 }
0x1604   :  { %p1293_p11 = por %p1292_p10, %p1291_p9 }
0x1606   :  { %p1294_p12 = pnand %p1293_p11, %p1287_p8 }
0x1666   :  { %v899_v50 = vpop.permute.xlu1 %898 }
0x1667   :  { %902 = vst.msk [vmem:[#allocation2] sm:$0xf] %vm901_vm6, %v899_v50 }
0x1668   :  { %1297 = shalt.err (!%p1294_p12)
}
0x1669   :  { %s1298_s22 = scalar_lea.hbm %s1798_s5, 64 }
0x166a   :  { %p1299_p13 = scmp.ne.s32.totalorder %s1798_s5, %s1298_s22  ;;  %p1302_p0 = scmp.lt.u32.totalorder %s1298_s22, %s1798_s5 }
0x166c   :  { %p1304_p1 = pnand %p1302_p0, %p1299_p13 }
0x166e   :  { %1307 = shalt.err (!%p1304_p1)
}
0x166f   :  { %917 = dma.vmem_to_hbm [thread:$0]  %s915_s18, 64, %s1798_s5, [#allocation3]  }
0x1670   :  { %1308 = dma.done.wait [#allocation3], 64  }
0x1671   :  { %1309 = vsyncadd [#allocation3], 4294967232 }
0x1672   :  { %1310 = dma.done.wait [#allocation5], 64  }
0x1673   :  { %1311 = vsyncadd [#allocation5], 4294967232 }
0x1674   :  { %934 = vsyncpa [#allocation3], 1 }
0x1675   :  { %935 = vsyncpa [#allocation5], 1 }

</bundles_post_ra>
